<compile_context>
chip_gen: v5e
topology: v5e:2x2
jax: 0.10.0
libtpu: 0.0.40
codegen_flags: <defaults>
</compile_context>

<pallas_src>
import jax
import jax.numpy as jnp
import numpy as np
from jax.experimental import pallas as pl
from jax.experimental.pallas import tpu as pltpu

BN_EPS = 1e-5  # PyTorch BatchNorm1d default eps

# For production shapes on v6e/v7x set this to jnp.bfloat16 (matmul operands only;
# BN statistics, scale/shift and the tanh epilogue stay f32 via
# preferred_element_type).  Kept f32 here so the small-shape 1e-3 check is exact.
MATMUL_DTYPE = jnp.float32


def _pointgencon_kernel(grid_ref, feat_ref, sel_ref,
                        w1g_ref, w1f_ref, g1_ref, be1_ref,
                        w2_ref, g2_ref, be2_ref,
                        w3_ref, g3_ref, be3_ref,
                        w4_ref, b4_ref,
                        o_ref):
    """One PointGenCon decoder (one primitive) per grid step; channels-first.

    grid_ref : (2, BP)      rand_grid for this primitive, batch*points on lanes
    feat_ref : (bneck, B)   latent code (same block for every grid step)
    sel_ref  : (B, BP)      one-hot batch->point selector (shared); broadcasts latent
    wK_ref   : (Cout, Cin)  1x1-conv weights, torch layout
    gK/beK   : (C, 1)       BatchNorm gamma / beta (per channel, broadcast over lanes)
    b4_ref   : (3, 1)       final conv bias (b1..b3 dropped: cancelled by BN centering)
    o_ref    : (3, BP)      lane-dense output tile
    """
    f32 = jnp.float32

    def mm(a, b):
        return jnp.dot(a.astype(MATMUL_DTYPE), b.astype(MATMUL_DTYPE),
                       preferred_element_type=f32)

    # ---- layer-1 split: latent projection once per batch element ----
    feat_proj = mm(w1f_ref[...], feat_ref[...])                          # (C0, B)
    h = mm(w1g_ref[...], grid_ref[...]) + mm(feat_proj, sel_ref[...])    # (C0, BP)

    def bn_relu(h, g_ref, be_ref):
        # Training-mode BatchNorm1d semantics: batch statistics over
        # (batch, points), biased variance — single reduction pass,
        # folded into one per-channel scale/shift FMA.
        n = h.shape[1]
        mean = jnp.sum(h, axis=1, keepdims=True) / n
        ex2 = jnp.sum(h * h, axis=1, keepdims=True) / n
        var = ex2 - mean * mean
        scale = g_ref[...] * jax.lax.rsqrt(var + BN_EPS)
        shift = be_ref[...] - mean * scale
        return jnp.maximum(h * scale + shift, 0.0)

    h = bn_relu(h, g1_ref, be1_ref)
    h = bn_relu(mm(w2_ref[...], h), g2_ref, be2_ref)
    h = bn_relu(mm(w3_ref[...], h), g3_ref, be3_ref)
    o_ref[...] = jnp.tanh(mm(w4_ref[...], h) + b4_ref[...])              # (3, BP)


def run_decoders(grid_cf, featT, sel, dec_params):
    """grid_cf: (nb, 2, B*P);  featT: (bneck, B);  sel: (B, B*P);
    dec_params: per-primitive-stacked weights/BN params.  Returns (nb, 3, B*P)."""
    nb, _, BP = grid_cf.shape

    def per_prim(a):
        # squeeze the primitive axis, take the rest of the array as one block
        return pl.BlockSpec((None,) + a.shape[1:],
                            lambda i, _nd=a.ndim: (i,) + (0,) * (_nd - 1))

    def shared(a):
        # same (only) block for every grid step -> DMA'd once, no per-step refetch
        return pl.BlockSpec(a.shape, lambda i, _nd=a.ndim: (0,) * _nd)

    in_specs = ([per_prim(grid_cf), shared(featT), shared(sel)]
                + [per_prim(p) for p in dec_params])
    out_spec = pl.BlockSpec((None, 3, BP), lambda i: (i, 0, 0))

    return pl.pallas_call(
        _pointgencon_kernel,
        grid=(nb,),
        in_specs=in_specs,
        out_specs=out_spec,
        out_shape=jax.ShapeDtypeStruct((nb, 3, BP), jnp.float32),
        compiler_params=pltpu.CompilerParams(
            dimension_semantics=("parallel",),
            # Explicit VMEM budget; at production shapes (bneck=1024) re-derive
            # this for v7x's 64 MiB/TC so double-buffering stays alive.
            vmem_limit_bytes=32 * 1024 * 1024,
        ),
    )(grid_cf, featT, sel, *dec_params)


def svr_curskenet_forward(x_img, enc_params, kernel_dec_params, rand_grids, bneck):
    """Full forward (encoder stand-in in plain JAX glue, decoders in Pallas).

    x_img      : (B, Cimg, H, W)  NCHW image
    rand_grids : (nb, B, 2, P)    [uniform(0,1) row ; zeros row] per primitive
    returns    : (B, nb*P, 3)
    """
    nb, B, _, P = rand_grids.shape
    BP = B * P
    w_enc, b_enc = enc_params

    # x = x[:, :3, :, :]
    # TODO(synk): resnet18 encoder is an external (torchvision-style) dependency not
    # provided here; stand-in = global-average-pool over spatial + linear projection.
    pooled = jnp.mean(x_img[:, :3, :, :], axis=(2, 3))            # (B, 3)
    feat = (pooled @ w_enc + b_enc).astype(jnp.float32)           # (B, bneck)

    # Channels-first, batch folded onto the point/lane axis.  The latent is NOT
    # expanded over points here — that broadcast happens inside the kernel.
    grid_cf = jnp.transpose(rand_grids, (0, 2, 1, 3)).reshape(nb, 2, BP).astype(jnp.float32)
    featT = feat.T                                                # (bneck, B)
    sel = (jnp.arange(BP)[None, :] // P == jnp.arange(B)[:, None]).astype(jnp.float32)

    out = run_decoders(grid_cf, featT, sel, kernel_dec_params)    # (nb, 3, BP)
    # torch: cat(outs, dim=2).transpose(2, 1)  ->  (B, nb*P, 3)
    out = out.reshape(nb, 3, B, P)
    return jnp.transpose(out, (2, 0, 3, 1)).reshape(B, nb * P, 3)


# ------------------------- plain-JAX reference (torch semantics) -------------------------

def _ref_forward(x_img, enc_params, ref_dec_params, rand_grids, bneck):
    (w1, b1, g1, be1, w2, b2, g2, be2, w3, b3, g3, be3, w4, b4) = ref_dec_params
    nb, B, _, P = rand_grids.shape
    w_enc, b_enc = enc_params
    pooled = jnp.mean(x_img[:, :3, :, :], axis=(2, 3))
    feat = pooled @ w_enc + b_enc

    def conv1x1(h, w, b):  # h: (B, Cin, P), w: (Cout, Cin), b: (Cout,)
        return jnp.einsum('oc,bcp->bop', w, h) + b.reshape(1, -1, 1)

    def bn(h, g, be):
        m = jnp.mean(h, axis=(0, 2), keepdims=True)
        v = jnp.mean((h - m) ** 2, axis=(0, 2), keepdims=True)
        return (h - m) / jnp.sqrt(v + BN_EPS) * g.reshape(1, -1, 1) + be.reshape(1, -1, 1)

    outs = []
    for i in range(nb):
        y = jnp.concatenate(
            [rand_grids[i], jnp.broadcast_to(feat[:, :, None], (B, bneck, P))], axis=1)
        h = jax.nn.relu(bn(conv1x1(y, w1[i], b1[i]), g1[i], be1[i]))
        h = jax.nn.relu(bn(conv1x1(h, w2[i], b2[i]), g2[i], be2[i]))
        h = jax.nn.relu(bn(conv1x1(h, w3[i], b3[i]), g3[i], be3[i]))
        h = jnp.tanh(conv1x1(h, w4[i], b4[i]))
        outs.append(h)
    return jnp.transpose(jnp.concatenate(outs, axis=2), (0, 2, 1))


# ---------------------------------------- main ----------------------------------------

if __name__ == "__main__":
    # small shapes consistent with the module's forward
    B, Cimg, H, W = 2, 4, 16, 16
    num_points, bneck, nb = 40, 32, 5
    P = num_points // nb        # 8
    C0 = 2 + bneck              # 34
    C1 = C0 // 2                # 17
    C2 = C0 // 4                # 8

    key = jax.random.PRNGKey(0)
    keys = iter(jax.random.split(key, 64))

    x_img = jax.random.normal(next(keys), (B, Cimg, H, W), jnp.float32)

    # deterministic synthetic parameters (torch Conv1d weight layout: (Cout, Cin))
    w_enc = 0.1 * jax.random.normal(next(keys), (3, bneck), jnp.float32)
    b_enc = 0.1 * jax.random.normal(next(keys), (bneck,), jnp.float32)
    enc_params = (w_enc, b_enc)

    def conv_params(cout, cin):
        w = 0.1 * jax.random.normal(next(keys), (nb, cout, cin), jnp.float32)
        b = 0.1 * jax.random.normal(next(keys), (nb, cout), jnp.float32)
        return w, b

    def bn_params(c):
        g = 1.0 + 0.1 * jax.random.normal(next(keys), (nb, c), jnp.float32)
        be = 0.1 * jax.random.normal(next(keys), (nb, c), jnp.float32)
        return g, be

    w1, b1 = conv_params(C0, C0); g1, be1 = bn_params(C0)
    w2, b2 = conv_params(C1, C0); g2, be2 = bn_params(C1)
    w3, b3 = conv_params(C2, C1); g3, be3 = bn_params(C2)
    w4, b4 = conv_params(3, C2)
    ref_dec_params = [w1, b1, g1, be1, w2, b2, g2, be2, w3, b3, g3, be3, w4, b4]

    # Kernel parameter packing:
    #  * layer-1 weight split into grid (Cin=2) and latent (Cin=bneck) parts
    #  * conv biases b1..b3 dropped — exactly cancelled by training-mode BN centering
    #  * per-channel params get a trailing lane-broadcast axis
    kernel_dec_params = [
        w1[:, :, :2], w1[:, :, 2:], g1[..., None], be1[..., None],
        w2, g2[..., None], be2[..., None],
        w3, g3[..., None], be3[..., None],
        w4, b4[..., None],
    ]

    # rand_grid: uniform(0,1) first row, zeros second row (per primitive)
    rg = []
    for _ in range(nb):
        u = jax.random.uniform(next(keys), (B, 1, P), jnp.float32)
        rg.append(jnp.concatenate([u, jnp.zeros((B, 1, P), jnp.float32)], axis=1))
    rand_grids = jnp.stack(rg)   # (nb, B, 2, P)

    out = svr_curskenet_forward(x_img, enc_params, kernel_dec_params, rand_grids, bneck)
    out = jax.block_until_ready(out)

    ref = _ref_forward(x_img, enc_params, ref_dec_params, rand_grids, bneck)
    ref = jax.block_until_ready(ref)

    assert out.shape == (B, num_points, 3), out.shape
    err = float(np.max(np.abs(np.asarray(out) - np.asarray(ref))))
    assert np.allclose(np.asarray(out), np.asarray(ref), rtol=1e-3, atol=1e-3), err
    print("KERNEL_OK")
</pallas_src>

<mosaic_0001>
module attributes {stable_mosaic.version = 11 : i64} {
  func.func @_pointgencon_kernel(%arg0: i32, %arg1: memref<1x2x16xf32, #tpu.memory_space<vmem>>, %arg2: memref<32x2xf32, #tpu.memory_space<vmem>>, %arg3: memref<2x16xf32, #tpu.memory_space<vmem>>, %arg4: memref<1x34x2xf32, #tpu.memory_space<vmem>>, %arg5: memref<1x34x32xf32, #tpu.memory_space<vmem>>, %arg6: memref<1x34x1xf32, #tpu.memory_space<vmem>>, %arg7: memref<1x34x1xf32, #tpu.memory_space<vmem>>, %arg8: memref<1x17x34xf32, #tpu.memory_space<vmem>>, %arg9: memref<1x17x1xf32, #tpu.memory_space<vmem>>, %arg10: memref<1x17x1xf32, #tpu.memory_space<vmem>>, %arg11: memref<1x8x17xf32, #tpu.memory_space<vmem>>, %arg12: memref<1x8x1xf32, #tpu.memory_space<vmem>>, %arg13: memref<1x8x1xf32, #tpu.memory_space<vmem>>, %arg14: memref<1x3x8xf32, #tpu.memory_space<vmem>>, %arg15: memref<1x3x1xf32, #tpu.memory_space<vmem>>, %arg16: memref<1x3x16xf32, #tpu.memory_space<vmem>>) attributes {dimension_semantics = [#tpu.dimension_semantics<parallel>], iteration_bounds = array<i64: 5>, scalar_prefetch = 0 : i64, scratch_operands = 0 : i64, tpu.core_type = #tpu.core_type<tc>, window_params = [{transform_indices = @transform_0, window_bounds = array<i64: 1, 2, 16>}, {pipeline_mode = #tpu.pipeline_mode<synchronous>, transform_indices = @transform_1, window_bounds = array<i64: 32, 2>}, {pipeline_mode = #tpu.pipeline_mode<synchronous>, transform_indices = @transform_2, window_bounds = array<i64: 2, 16>}, {transform_indices = @transform_3, window_bounds = array<i64: 1, 34, 2>}, {transform_indices = @transform_4, window_bounds = array<i64: 1, 34, 32>}, {transform_indices = @transform_5, window_bounds = array<i64: 1, 34, 1>}, {transform_indices = @transform_6, window_bounds = array<i64: 1, 34, 1>}, {transform_indices = @transform_7, window_bounds = array<i64: 1, 17, 34>}, {transform_indices = @transform_8, window_bounds = array<i64: 1, 17, 1>}, {transform_indices = @transform_9, window_bounds = array<i64: 1, 17, 1>}, {transform_indices = @transform_10, window_bounds = array<i64: 1, 8, 17>}, {transform_indices = @transform_11, window_bounds = array<i64: 1, 8, 1>}, {transform_indices = @transform_12, window_bounds = array<i64: 1, 8, 1>}, {transform_indices = @transform_13, window_bounds = array<i64: 1, 3, 8>}, {transform_indices = @transform_14, window_bounds = array<i64: 1, 3, 1>}, {transform_indices = @transform_15, window_bounds = array<i64: 1, 3, 16>}]} {
    %c0 = arith.constant 0 : index
    %c0_0 = arith.constant 0 : index
    %c0_1 = arith.constant 0 : index
    %0 = vector.load %arg5[%c0, %c0_0, %c0_1] : memref<1x34x32xf32, #tpu.memory_space<vmem>>, vector<1x34x32xf32>
    %1 = vector.shape_cast %0 : vector<1x34x32xf32> to vector<34x32xf32>
    %c0_2 = arith.constant 0 : index
    %c0_3 = arith.constant 0 : index
    %2 = vector.load %arg2[%c0_2, %c0_3] : memref<32x2xf32, #tpu.memory_space<vmem>>, vector<32x2xf32>
    %cst = arith.constant dense<0.000000e+00> : vector<34x2xf32>
    %3 = tpu.matmul %1, %2, %cst {dimension_numbers = #tpu.dot_dimension_numbers<[1], [0], [0], [1], [0, 0, 1, 1], [], []>} : vector<34x32xf32>, vector<32x2xf32>, vector<34x2xf32> -> vector<34x2xf32>
    %c0_4 = arith.constant 0 : index
    %c0_5 = arith.constant 0 : index
    %c0_6 = arith.constant 0 : index
    %4 = vector.load %arg4[%c0_4, %c0_5, %c0_6] : memref<1x34x2xf32, #tpu.memory_space<vmem>>, vector<1x34x2xf32>
    %5 = vector.shape_cast %4 : vector<1x34x2xf32> to vector<34x2xf32>
    %c0_7 = arith.constant 0 : index
    %c0_8 = arith.constant 0 : index
    %c0_9 = arith.constant 0 : index
    %6 = vector.load %arg1[%c0_7, %c0_8, %c0_9] : memref<1x2x16xf32, #tpu.memory_space<vmem>>, vector<1x2x16xf32>
    %7 = vector.shape_cast %6 : vector<1x2x16xf32> to vector<2x16xf32>
    %cst_10 = arith.constant dense<0.000000e+00> : vector<34x16xf32>
    %8 = tpu.matmul %5, %7, %cst_10 {dimension_numbers = #tpu.dot_dimension_numbers<[1], [0], [0], [1], [0, 0, 1, 1], [], []>} : vector<34x2xf32>, vector<2x16xf32>, vector<34x16xf32> -> vector<34x16xf32>
    %c0_11 = arith.constant 0 : index
    %c0_12 = arith.constant 0 : index
    %9 = vector.load %arg3[%c0_11, %c0_12] : memref<2x16xf32, #tpu.memory_space<vmem>>, vector<2x16xf32>
    %cst_13 = arith.constant dense<0.000000e+00> : vector<34x16xf32>
    %10 = tpu.matmul %3, %9, %cst_13 {dimension_numbers = #tpu.dot_dimension_numbers<[1], [0], [0], [1], [0, 0, 1, 1], [], []>} : vector<34x2xf32>, vector<2x16xf32>, vector<34x16xf32> -> vector<34x16xf32>
    %11 = arith.addf %8, %10 : vector<34x16xf32>
    %cst_14 = arith.constant dense<0.000000e+00> : vector<34xf32>
    %12 = vector.multi_reduction <add>, %11, %cst_14 [1] : vector<34x16xf32> to vector<34xf32>
    %13 = vector.shape_cast %12 : vector<34xf32> to vector<34x1xf32>
    %cst_15 = arith.constant 1.600000e+01 : f32
    %14 = vector.broadcast %cst_15 : f32 to vector<34x1xf32>
    %15 = arith.divf %13, %14 : vector<34x1xf32>
    %16 = arith.mulf %11, %11 : vector<34x16xf32>
    %cst_16 = arith.constant dense<0.000000e+00> : vector<34xf32>
    %17 = vector.multi_reduction <add>, %16, %cst_16 [1] : vector<34x16xf32> to vector<34xf32>
    %18 = vector.shape_cast %17 : vector<34xf32> to vector<34x1xf32>
    %cst_17 = arith.constant 1.600000e+01 : f32
    %19 = vector.broadcast %cst_17 : f32 to vector<34x1xf32>
    %20 = arith.divf %18, %19 : vector<34x1xf32>
    %21 = arith.mulf %15, %15 : vector<34x1xf32>
    %22 = arith.subf %20, %21 : vector<34x1xf32>
    %c0_18 = arith.constant 0 : index
    %c0_19 = arith.constant 0 : index
    %c0_20 = arith.constant 0 : index
    %23 = vector.load %arg6[%c0_18, %c0_19, %c0_20] : memref<1x34x1xf32, #tpu.memory_space<vmem>>, vector<1x34x1xf32>
    %24 = vector.shape_cast %23 : vector<1x34x1xf32> to vector<34x1xf32>
    %cst_21 = arith.constant 9.99999974E-6 : f32
    %25 = vector.broadcast %cst_21 : f32 to vector<34x1xf32>
    %26 = arith.addf %22, %25 : vector<34x1xf32>
    %27 = math.rsqrt %26 : vector<34x1xf32>
    %28 = arith.mulf %24, %27 : vector<34x1xf32>
    %c0_22 = arith.constant 0 : index
    %c0_23 = arith.constant 0 : index
    %c0_24 = arith.constant 0 : index
    %29 = vector.load %arg7[%c0_22, %c0_23, %c0_24] : memref<1x34x1xf32, #tpu.memory_space<vmem>>, vector<1x34x1xf32>
    %30 = vector.shape_cast %29 : vector<1x34x1xf32> to vector<34x1xf32>
    %31 = arith.mulf %15, %28 : vector<34x1xf32>
    %32 = arith.subf %30, %31 : vector<34x1xf32>
    %33 = vector.broadcast %28 : vector<34x1xf32> to vector<34x16xf32>
    %34 = arith.mulf %11, %33 : vector<34x16xf32>
    %35 = vector.broadcast %32 : vector<34x1xf32> to vector<34x16xf32>
    %36 = arith.addf %34, %35 : vector<34x16xf32>
    %cst_25 = arith.constant 0.000000e+00 : f32
    %37 = vector.broadcast %cst_25 : f32 to vector<34x16xf32>
    %38 = arith.maximumf %36, %37 : vector<34x16xf32>
    %c0_26 = arith.constant 0 : index
    %c0_27 = arith.constant 0 : index
    %c0_28 = arith.constant 0 : index
    %39 = vector.load %arg8[%c0_26, %c0_27, %c0_28] : memref<1x17x34xf32, #tpu.memory_space<vmem>>, vector<1x17x34xf32>
    %40 = vector.shape_cast %39 : vector<1x17x34xf32> to vector<17x34xf32>
    %cst_29 = arith.constant dense<0.000000e+00> : vector<17x16xf32>
    %41 = tpu.matmul %40, %38, %cst_29 {dimension_numbers = #tpu.dot_dimension_numbers<[1], [0], [0], [1], [0, 0, 1, 1], [], []>} : vector<17x34xf32>, vector<34x16xf32>, vector<17x16xf32> -> vector<17x16xf32>
    %cst_30 = arith.constant dense<0.000000e+00> : vector<17xf32>
    %42 = vector.multi_reduction <add>, %41, %cst_30 [1] : vector<17x16xf32> to vector<17xf32>
    %43 = vector.shape_cast %42 : vector<17xf32> to vector<17x1xf32>
    %cst_31 = arith.constant 1.600000e+01 : f32
    %44 = vector.broadcast %cst_31 : f32 to vector<17x1xf32>
    %45 = arith.divf %43, %44 : vector<17x1xf32>
    %46 = arith.mulf %41, %41 : vector<17x16xf32>
    %cst_32 = arith.constant dense<0.000000e+00> : vector<17xf32>
    %47 = vector.multi_reduction <add>, %46, %cst_32 [1] : vector<17x16xf32> to vector<17xf32>
    %48 = vector.shape_cast %47 : vector<17xf32> to vector<17x1xf32>
    %cst_33 = arith.constant 1.600000e+01 : f32
    %49 = vector.broadcast %cst_33 : f32 to vector<17x1xf32>
    %50 = arith.divf %48, %49 : vector<17x1xf32>
    %51 = arith.mulf %45, %45 : vector<17x1xf32>
    %52 = arith.subf %50, %51 : vector<17x1xf32>
    %c0_34 = arith.constant 0 : index
    %c0_35 = arith.constant 0 : index
    %c0_36 = arith.constant 0 : index
    %53 = vector.load %arg9[%c0_34, %c0_35, %c0_36] : memref<1x17x1xf32, #tpu.memory_space<vmem>>, vector<1x17x1xf32>
    %54 = vector.shape_cast %53 : vector<1x17x1xf32> to vector<17x1xf32>
    %cst_37 = arith.constant 9.99999974E-6 : f32
    %55 = vector.broadcast %cst_37 : f32 to vector<17x1xf32>
    %56 = arith.addf %52, %55 : vector<17x1xf32>
    %57 = math.rsqrt %56 : vector<17x1xf32>
    %58 = arith.mulf %54, %57 : vector<17x1xf32>
    %c0_38 = arith.constant 0 : index
    %c0_39 = arith.constant 0 : index
    %c0_40 = arith.constant 0 : index
    %59 = vector.load %arg10[%c0_38, %c0_39, %c0_40] : memref<1x17x1xf32, #tpu.memory_space<vmem>>, vector<1x17x1xf32>
    %60 = vector.shape_cast %59 : vector<1x17x1xf32> to vector<17x1xf32>
    %61 = arith.mulf %45, %58 : vector<17x1xf32>
    %62 = arith.subf %60, %61 : vector<17x1xf32>
    %63 = vector.broadcast %58 : vector<17x1xf32> to vector<17x16xf32>
    %64 = arith.mulf %41, %63 : vector<17x16xf32>
    %65 = vector.broadcast %62 : vector<17x1xf32> to vector<17x16xf32>
    %66 = arith.addf %64, %65 : vector<17x16xf32>
    %cst_41 = arith.constant 0.000000e+00 : f32
    %67 = vector.broadcast %cst_41 : f32 to vector<17x16xf32>
    %68 = arith.maximumf %66, %67 : vector<17x16xf32>
    %c0_42 = arith.constant 0 : index
    %c0_43 = arith.constant 0 : index
    %c0_44 = arith.constant 0 : index
    %69 = vector.load %arg11[%c0_42, %c0_43, %c0_44] : memref<1x8x17xf32, #tpu.memory_space<vmem>>, vector<1x8x17xf32>
    %70 = vector.shape_cast %69 : vector<1x8x17xf32> to vector<8x17xf32>
    %cst_45 = arith.constant dense<0.000000e+00> : vector<8x16xf32>
    %71 = tpu.matmul %70, %68, %cst_45 {dimension_numbers = #tpu.dot_dimension_numbers<[1], [0], [0], [1], [0, 0, 1, 1], [], []>} : vector<8x17xf32>, vector<17x16xf32>, vector<8x16xf32> -> vector<8x16xf32>
    %cst_46 = arith.constant dense<0.000000e+00> : vector<8xf32>
    %72 = vector.multi_reduction <add>, %71, %cst_46 [1] : vector<8x16xf32> to vector<8xf32>
    %73 = vector.shape_cast %72 : vector<8xf32> to vector<8x1xf32>
    %cst_47 = arith.constant 1.600000e+01 : f32
    %74 = vector.broadcast %cst_47 : f32 to vector<8x1xf32>
    %75 = arith.divf %73, %74 : vector<8x1xf32>
    %76 = arith.mulf %71, %71 : vector<8x16xf32>
    %cst_48 = arith.constant dense<0.000000e+00> : vector<8xf32>
    %77 = vector.multi_reduction <add>, %76, %cst_48 [1] : vector<8x16xf32> to vector<8xf32>
    %78 = vector.shape_cast %77 : vector<8xf32> to vector<8x1xf32>
    %cst_49 = arith.constant 1.600000e+01 : f32
    %79 = vector.broadcast %cst_49 : f32 to vector<8x1xf32>
    %80 = arith.divf %78, %79 : vector<8x1xf32>
    %81 = arith.mulf %75, %75 : vector<8x1xf32>
    %82 = arith.subf %80, %81 : vector<8x1xf32>
    %c0_50 = arith.constant 0 : index
    %c0_51 = arith.constant 0 : index
    %c0_52 = arith.constant 0 : index
    %83 = vector.load %arg12[%c0_50, %c0_51, %c0_52] : memref<1x8x1xf32, #tpu.memory_space<vmem>>, vector<1x8x1xf32>
    %84 = vector.shape_cast %83 : vector<1x8x1xf32> to vector<8x1xf32>
    %cst_53 = arith.constant 9.99999974E-6 : f32
    %85 = vector.broadcast %cst_53 : f32 to vector<8x1xf32>
    %86 = arith.addf %82, %85 : vector<8x1xf32>
    %87 = math.rsqrt %86 : vector<8x1xf32>
    %88 = arith.mulf %84, %87 : vector<8x1xf32>
    %c0_54 = arith.constant 0 : index
    %c0_55 = arith.constant 0 : index
    %c0_56 = arith.constant 0 : index
    %89 = vector.load %arg13[%c0_54, %c0_55, %c0_56] : memref<1x8x1xf32, #tpu.memory_space<vmem>>, vector<1x8x1xf32>
    %90 = vector.shape_cast %89 : vector<1x8x1xf32> to vector<8x1xf32>
    %91 = arith.mulf %75, %88 : vector<8x1xf32>
    %92 = arith.subf %90, %91 : vector<8x1xf32>
    %93 = vector.broadcast %88 : vector<8x1xf32> to vector<8x16xf32>
    %94 = arith.mulf %71, %93 : vector<8x16xf32>
    %95 = vector.broadcast %92 : vector<8x1xf32> to vector<8x16xf32>
    %96 = arith.addf %94, %95 : vector<8x16xf32>
    %cst_57 = arith.constant 0.000000e+00 : f32
    %97 = vector.broadcast %cst_57 : f32 to vector<8x16xf32>
    %98 = arith.maximumf %96, %97 : vector<8x16xf32>
    %c0_58 = arith.constant 0 : index
    %c0_59 = arith.constant 0 : index
    %c0_60 = arith.constant 0 : index
    %99 = vector.load %arg14[%c0_58, %c0_59, %c0_60] : memref<1x3x8xf32, #tpu.memory_space<vmem>>, vector<1x3x8xf32>
    %100 = vector.shape_cast %99 : vector<1x3x8xf32> to vector<3x8xf32>
    %cst_61 = arith.constant dense<0.000000e+00> : vector<3x16xf32>
    %101 = tpu.matmul %100, %98, %cst_61 {dimension_numbers = #tpu.dot_dimension_numbers<[1], [0], [0], [1], [0, 0, 1, 1], [], []>} : vector<3x8xf32>, vector<8x16xf32>, vector<3x16xf32> -> vector<3x16xf32>
    %c0_62 = arith.constant 0 : index
    %c0_63 = arith.constant 0 : index
    %c0_64 = arith.constant 0 : index
    %102 = vector.load %arg15[%c0_62, %c0_63, %c0_64] : memref<1x3x1xf32, #tpu.memory_space<vmem>>, vector<1x3x1xf32>
    %103 = vector.shape_cast %102 : vector<1x3x1xf32> to vector<3x1xf32>
    %104 = vector.broadcast %103 : vector<3x1xf32> to vector<3x16xf32>
    %105 = arith.addf %101, %104 : vector<3x16xf32>
    %106 = math.tanh %105 : vector<3x16xf32>
    %c0_65 = arith.constant 0 : index
    %c0_66 = arith.constant 0 : index
    %c0_67 = arith.constant 0 : index
    %107 = vector.load %arg16[%c0_65, %c0_66, %c0_67] : memref<1x3x16xf32, #tpu.memory_space<vmem>>, vector<1x3x16xf32>
    %108 = vector.shape_cast %107 : vector<1x3x16xf32> to vector<3x16xf32>
    %109 = vector.shape_cast %106 : vector<3x16xf32> to vector<1x3x16xf32>
    tpu.vector_store %arg16[%c0_65, %c0_66, %c0_67], %109 {strides = array<i32>} : memref<1x3x16xf32, #tpu.memory_space<vmem>>, vector<1x3x16xf32>,
    return
  }
  func.func @transform_0(%arg0: i32) -> (i32, i32, i32) {
    %c0_i32 = arith.constant 0 : i32
    %c0_i32_0 = arith.constant 0 : i32
    %c0_i32_1 = arith.constant 0 : i32
    return %arg0, %c0_i32, %c0_i32_0 : i32, i32, i32
  }
  func.func @transform_1(%arg0: i32) -> (i32, i32) {
    %c0_i32 = arith.constant 0 : i32
    %c0_i32_0 = arith.constant 0 : i32
    %c0_i32_1 = arith.constant 0 : i32
    return %c0_i32, %c0_i32_0 : i32, i32
  }
  func.func @transform_2(%arg0: i32) -> (i32, i32) {
    %c0_i32 = arith.constant 0 : i32
    %c0_i32_0 = arith.constant 0 : i32
    %c0_i32_1 = arith.constant 0 : i32
    return %c0_i32, %c0_i32_0 : i32, i32
  }
  func.func @transform_3(%arg0: i32) -> (i32, i32, i32) {
    %c0_i32 = arith.constant 0 : i32
    %c0_i32_0 = arith.constant 0 : i32
    %c0_i32_1 = arith.constant 0 : i32
    return %arg0, %c0_i32, %c0_i32_0 : i32, i32, i32
  }
  func.func @transform_4(%arg0: i32) -> (i32, i32, i32) {
    %c0_i32 = arith.constant 0 : i32
    %c0_i32_0 = arith.constant 0 : i32
    %c0_i32_1 = arith.constant 0 : i32
    return %arg0, %c0_i32, %c0_i32_0 : i32, i32, i32
  }
  func.func @transform_5(%arg0: i32) -> (i32, i32, i32) {
    %c0_i32 = arith.constant 0 : i32
    %c0_i32_0 = arith.constant 0 : i32
    %c0_i32_1 = arith.constant 0 : i32
    return %arg0, %c0_i32, %c0_i32_0 : i32, i32, i32
  }
  func.func @transform_6(%arg0: i32) -> (i32, i32, i32) {
    %c0_i32 = arith.constant 0 : i32
    %c0_i32_0 = arith.constant 0 : i32
    %c0_i32_1 = arith.constant 0 : i32
    return %arg0, %c0_i32, %c0_i32_0 : i32, i32, i32
  }
  func.func @transform_7(%arg0: i32) -> (i32, i32, i32) {
    %c0_i32 = arith.constant 0 : i32
    %c0_i32_0 = arith.constant 0 : i32
    %c0_i32_1 = arith.constant 0 : i32
    return %arg0, %c0_i32, %c0_i32_0 : i32, i32, i32
  }
  func.func @transform_8(%arg0: i32) -> (i32, i32, i32) {
    %c0_i32 = arith.constant 0 : i32
    %c0_i32_0 = arith.constant 0 : i32
    %c0_i32_1 = arith.constant 0 : i32
    return %arg0, %c0_i32, %c0_i32_0 : i32, i32, i32
  }
  func.func @transform_9(%arg0: i32) -> (i32, i32, i32) {
    %c0_i32 = arith.constant 0 : i32
    %c0_i32_0 = arith.constant 0 : i32
    %c0_i32_1 = arith.constant 0 : i32
    return %arg0, %c0_i32, %c0_i32_0 : i32, i32, i32
  }
  func.func @transform_10(%arg0: i32) -> (i32, i32, i32) {
    %c0_i32 = arith.constant 0 : i32
    %c0_i32_0 = arith.constant 0 : i32
    %c0_i32_1 = arith.constant 0 : i32
    return %arg0, %c0_i32, %c0_i32_0 : i32, i32, i32
  }
  func.func @transform_11(%arg0: i32) -> (i32, i32, i32) {
    %c0_i32 = arith.constant 0 : i32
    %c0_i32_0 = arith.constant 0 : i32
    %c0_i32_1 = arith.constant 0 : i32
    return %arg0, %c0_i32, %c0_i32_0 : i32, i32, i32
  }
  func.func @transform_12(%arg0: i32) -> (i32, i32, i32) {
    %c0_i32 = arith.constant 0 : i32
    %c0_i32_0 = arith.constant 0 : i32
    %c0_i32_1 = arith.constant 0 : i32
    return %arg0, %c0_i32, %c0_i32_0 : i32, i32, i32
  }
  func.func @transform_13(%arg0: i32) -> (i32, i32, i32) {
    %c0_i32 = arith.constant 0 : i32
    %c0_i32_0 = arith.constant 0 : i32
    %c0_i32_1 = arith.constant 0 : i32
    return %arg0, %c0_i32, %c0_i32_0 : i32, i32, i32
  }
  func.func @transform_14(%arg0: i32) -> (i32, i32, i32) {
    %c0_i32 = arith.constant 0 : i32
    %c0_i32_0 = arith.constant 0 : i32
    %c0_i32_1 = arith.constant 0 : i32
    return %arg0, %c0_i32, %c0_i32_0 : i32, i32, i32
  }
  func.func @transform_15(%arg0: i32) -> (i32, i32, i32) {
    %c0_i32 = arith.constant 0 : i32
    %c0_i32_0 = arith.constant 0 : i32
    %c0_i32_1 = arith.constant 0 : i32
    return %arg0, %c0_i32, %c0_i32_0 : i32, i32, i32
  }
}

</mosaic_0001>

<bundles_post_ra>
// kernel: tpu_custom_call.1
= control target key start
LH: loop header
LB: loop body
LE: loop exit
PB: predicated region body
PF: predicated region fallthrough
CT: control target
= control target key end

     0   :  { %s2150_s0 = inlined_call_operand.vmem [shape: f32[5,2,16], index: 0, kind: input, shape index: {}]   ;;  %s2151_s1 = inlined_call_operand.vmem [shape: f32[32,2], index: 1, kind: input, shape index: {}]   ;;  %s2152_s2 = inlined_call_operand.vmem [shape: f32[2,16], index: 2, kind: input, shape index: {}]   ;;  %s2153_s3 = inlined_call_operand.vmem [shape: f32[5,34,2], index: 3, kind: input, shape index: {}]   ;;  %s2154_s4 = inlined_call_operand.vmem [shape: f32[5,34,32], index: 4, kind: input, shape index: {}]   ;;  %s2155_s5 = inlined_call_operand.vmem [shape: f32[5,34,1], index: 5, kind: input, shape index: {}]   ;;  %s2156_s6 = inlined_call_operand.vmem [shape: f32[5,34,1], index: 6, kind: input, shape index: {}]   ;;  %s2157_s7 = inlined_call_operand.vmem [shape: f32[5,17,34], index: 7, kind: input, shape index: {}]   ;;  %s2158_s8 = inlined_call_operand.vmem [shape: f32[5,17,1], index: 8, kind: input, shape index: {}]   ;;  %s2159_s9 = inlined_call_operand.vmem [shape: f32[5,17,1], index: 9, kind: input, shape index: {}]   ;;  %s2160_s10 = inlined_call_operand.vmem [shape: f32[5,8,17], index: 10, kind: input, shape index: {}]   ;;  %s2161_s11 = inlined_call_operand.vmem [shape: f32[5,8,1], index: 11, kind: input, shape index: {}]   ;;  %s2162_s12 = inlined_call_operand.vmem [shape: f32[5,8,1], index: 12, kind: input, shape index: {}]   ;;  %s2163_s13 = inlined_call_operand.vmem [shape: f32[5,3,8], index: 13, kind: input, shape index: {}]   ;;  %s2164_s14 = inlined_call_operand.vmem [shape: f32[5,3,1], index: 14, kind: input, shape index: {}]   ;;  %s2165_s15 = inlined_call_operand.hbm [shape: f32[5,3,16], index: 15, kind: output, shape index: {}]  }
   0x1   :  { %2174 = sst [smem:[#allocation12_spill]] %s2150_s0 }
   0x2   :  { %20 = vsyncpa [#allocation3], 0 }
   0x3   :  { %22 = vsyncpa [#allocation3 + $0x1], 0  ;;  %s1835_s18 = smov 0   ;;  %s1837_s19 = smov 0  }
   0x4   :  { %s1839_s20 = smov 0   ;;  %s1841_s21 = smov 0  }
   0x5 LB: > { %2175 = sst [smem:[#allocation5_spill]] %s1739_s18  ;;  %s1856_s22 = sadd.s32 4294967295, %s1751_s21   ;;  %s1751_s21 = sphi %s1841_s21, %s2189_s21   ;;  %s1747_s20 = sphi %s1839_s20, %s2191_s20   ;;  %s1743_s19 = sphi %s1837_s19, %s2193_s19   ;;  %s1739_s18 = sphi %s1835_s18, %s2192_s18  }
   0x6   : > { %2176 = sst [smem:[#allocation6_spill]] %s1747_s20  ;;  %s1575_s23 = sadd.s32 4294967294, %s1751_s21  }
   0x7   : > { %2177 = sst [smem:[#allocation7_spill]] %s1751_s21  ;;  %s1860_s24 = sadd.s32 1, %s1751_s21  }
   0x8   : > { %2178 = sst [smem:[#allocation8_spill]] %s1860_s24  ;;  %s415_s25 = sadd.s32 1, %s1747_s20 }
   0x9   : > { %s412_s26 = ssub.s32 %s1751_s21, %s1860_s24  ;;  %p425_p0 = scmp.ne.s32.totalorder %s1747_s20, %s1743_s19 }
   0xa   : > { %p413_p1 = scmp.eq.s32.totalorder %s412_s26, 0  ;;  %p426_p2 = scmp.eq.s32.totalorder %s1856_s22, 4 }
   0xb   : > { %p431_p3 = scmp.ne.s32.totalorder %s1743_s19, %s1739_s18  ;;  %p432_p4 = scmp.eq.s32.totalorder %s1575_s23, 4 }
   0xc   : > { %s1871_s27 = scalar_select %p413_p1, %s1747_s20, %s415_s25  }
   0xd   : > { %p1873_p5 = por %p426_p2, %p425_p0  ;;  %p1877_p6 = por %p432_p4, %p431_p3 }
   0xe   : > { %2179 = sst [smem:[#allocation9_spill]] %s1871_s27  ;;  %p1578_p7 = scmp.ge.s32.totalorder %s1751_s21, 1 }
   0xf   : > { %s2180_s28 = scalar_select %p1873_p5, 1, 0 }
  0x10   : > { %s2182_s29 = scalar_select %p1877_p6, 1, 0 }
  0x11   : > { %2181 = sst [smem:[#allocation10_spill]] %s2180_s28  ;;  %p554_p8 = scmp.lt.s32.totalorder %s1751_s21, 6 }
  0x12   : > { %2183 = sst [smem:[#allocation11_spill]] %s2182_s29 }
  0x13   : > { %p555_p9 = pnand %p1578_p7, %p554_p8 }
  0x14   : > { %p656_p10 = scmp.lt.s32.totalorder (!%p555_p9), %s1856_s22, 4  ;;  %s2184_s0 = sld [smem:[#allocation12_spill]] (!%p555_p9) }
  0x15   : > { %558 = sbr.rel (%p555_p9) target bundleno = 1599 (0x63f), region = 80 }
  0x1a   : > { %v723_v0 = vld [vmem:[%s2151_s1 + $0x18] sm:$0xff]  ;;  %v722_v1 = vld [vmem:[%s2151_s1 + $0x10] sm:$0xff]  ;;  %v721_v2 = vld [vmem:[%s2151_s1 + $0x8] sm:$0xff]  ;;  %s1894_s27 = scalar_select %p656_p10, %s1856_s22, 4  ;;  %vm724_vm0 = vcmask 261120   ;;  %vm795_vm1 = vcmask 1041408  }
  0x1b   : > { %752 = vmatpush.msra.mxu0 %v723_v0  ;;  %v720_v3 = vld [vmem:[%s2151_s1] sm:$0xff]  ;;  %vm779_vm2 = vcmask 15360   ;;  %vm881_vm3 = vcmask 130048   ;;  %vm894_vm4 = vcmask 123904   ;;  %v1753_v51 = vmov 16.0  }
  0x1c   : > { %s1900_s16 = smul.u32 40, %s1894_s27  ;;  %s1580_s17 = sshll.u32 %s1894_s27, 1  ;;  %v778_v11 = vld [vmem:[%s2152_s2] sm:$0x3]  ;;  %1667 = vrcp.f32 %v1753_v51 }
  0x1d   : > { %753 = vmatpush.msra.mxu0 %v722_v1  ;;  %s659_s25 = scalar_lea.vmem %s2184_s0, %s1580_s17  ;;  %1598 = vmatpush.msk.msra.mxu1 %vm795_vm1, %v778_v11  ;;  %s2092_s17 = sshll.u32 %s1894_s27, 3 }
  0x1e   : > { %s669_s18 = scalar_lea.vmem %s2154_s4, %s1900_s16  ;;  %s664_s20 = scalar_lea.vmem %s2153_s3, %s1900_s16  ;;  %v777_v5 = vld [vmem:[%s659_s25] sm:$0x3] }
  0x1f   : > { %754 = vmatpush.msra.mxu0 %v721_v2  ;;  %v715_v4 = vld [vmem:[%s669_s18] sm:$0xff]  ;;  %1604 = vmatpush.msk.msra.mxu2 %vm795_vm1, %v777_v5  ;;  %v716_v7 = vld [vmem:[%s669_s18 + $0x8] sm:$0xff]  ;;  %v717_v8 = vld [vmem:[%s669_s18 + $0x10] sm:$0xff]  ;;  %v1754_v2 = vmov 0   ;;  %s2011_s29 = scalar_lea.vmem %s2155_s5, %s1900_s16  ;;  %s2019_s23 = scalar_lea.vmem %s2156_s6, %s1900_s16 }
  0x20   : > { %v772_v6 = vld [vmem:[%s664_s20] sm:$0xff]  ;;  %v718_v9 = vld [vmem:[%s669_s18 + $0x18] sm:$0xff]  ;;  %v773_v12 = vld [vmem:[%s664_s20 + $0x8] sm:$0xff]  ;;  %1664 = vset.pattern.permute.xlu2 %v1754_v2  ;;  %1666 = vset.pattern.permute.xlu0 %v1754_v2  ;;  %s2042_s16 = smul.u32 24, %s1894_s27  ;;  %s698_s25 = scalar_lea.vmem %s2160_s10, %s2092_s17 }
  0x21   : > { %755 = vmatpush.msra.mxu0 %v720_v3  ;;  %1605 = vmatmul.msk.f32.vlgmr.msra.gmra.mxu2 %vm779_vm2, %v772_v6  ;;  %v719_v10 = vld [vmem:[%s669_s18 + $0x20] sm:$0x3]  ;;  %v774_v13 = vld [vmem:[%s664_s20 + $0x10] sm:$0xff]  ;;  %v775_v14 = vld [vmem:[%s664_s20 + $0x18] sm:$0xff]  ;;  %s702_s21 = scalar_lea.vmem %s2161_s11, %s2092_s17  ;;  %s706_s28 = scalar_lea.vmem %s2162_s12, %s2092_s17 }
  0x22   : > { %1593 = vmatmul.msk.f32.vlgmr.msra.gmra.mxu0 %vm724_vm0, %v715_v4  ;;  %v776_v15 = vld [vmem:[%s664_s20 + $0x20] sm:$0x3]  ;;  %v1668_v52 = vpop.eup %1667  ;;  %1665 = vset.pattern.permute.xlu1 %v1754_v2  ;;  %s684_s20 = scalar_lea.vmem %s2157_s7, %s2042_s16  ;;  %s2080_s18 = scalar_lea.vmem %s2158_s8, %s2042_s16 }
  0x23   : > { %v899_v53 = vmul.f32 16.0, %v1668_v52  ;;  %vm903_vm5 = vweird.f32 %v1668_v52  ;;  %s694_s30 = scalar_lea.vmem %s2159_s9, %s2042_s16 }
  0x25   : > { %v900_v54 = vsub.f32 1.0, %v899_v53  ;;  %v949_v53 = vld [vmem:[%s2011_s29 + $0x20] sm:$0x3] }
  0x27   : > { %v901_v55 = vmul.f32 %v1668_v52, %v900_v54  ;;  %v946_v54 = vld [vmem:[%s2011_s29 + $0x8] sm:$0xff] }
  0x29   : > { %1606 = vmatmul.msk.f32.gmra.mxu2 %vm779_vm2, %v773_v12  ;;  %v902_v57 = vadd.f32 %v1668_v52, %v901_v55 }
  0x2a   : > { %1594 = vmatmul.msk.f32.gmra.mxu0 %vm724_vm0, %v716_v7 }
  0x2b   : > { %v1967_v58 = vsel %vm903_vm5, %v1668_v52, %v902_v57 }
  0x31   : > { %1607 = vmatmul.msk.f32.gmra.mxu2 %vm779_vm2, %v774_v13 }
  0x32   : > { %1595 = vmatmul.msk.f32.gmra.mxu0 %vm724_vm0, %v717_v8 }
  0x39   : > { %1608 = vmatmul.msk.f32.gmra.mxu2 %vm779_vm2, %v775_v14 }
  0x3a   : > { %1596 = vmatmul.msk.f32.gmra.mxu0 %vm724_vm0, %v718_v9 }
  0x41   : > { %1609 = vmatmul.msk.f32.gmra.mxu2 %vm779_vm2, %v776_v15 }
  0x42   : > { %1597 = vmatmul.msk.f32.gmra.mxu0 %vm724_vm0, %v719_v10 }
  0x9f   : > { %v757_v16 = vpop.f32.mrf.mxu0 }
  0xa0   : > { %1599 = vmatmul.msk.f32.vlgmr.msra.gmra.mxu1 %vm779_vm2, %v757_v16 }
  0xa4   : > { %v866_v21 = vpop.f32.mrf.mxu2 }
  0xa7   : > { %v760_v17 = vpop.f32.mrf.mxu0 }
  0xa8   : > { %1600 = vmatmul.msk.f32.gmra.mxu1 %vm779_vm2, %v760_v17 }
  0xac   : > { %v869_v23 = vpop.f32.mrf.mxu2 }
  0xaf   : > { %v763_v18 = vpop.f32.mrf.mxu0 }
  0xb0   : > { %1601 = vmatmul.msk.f32.gmra.mxu1 %vm779_vm2, %v763_v18 }
  0xb4   : > { %v872_v26 = vpop.f32.mrf.mxu2 }
  0xb7   : > { %v766_v19 = vpop.f32.mrf.mxu0 }
  0xb8   : > { %1602 = vmatmul.msk.f32.gmra.mxu1 %vm779_vm2, %v766_v19 }
  0xbc   : > { %v875_v31 = vpop.f32.mrf.mxu2 }
  0xbf   : > { %v769_v20 = vpop.f32.mrf.mxu0 }
  0xc0   : > { %1603 = vmatmul.msk.f32.gmra.mxu1 %vm779_vm2, %v769_v20 }
  0xc4   : > { %v878_v37 = vpop.f32.mrf.mxu2 }
 0x11d   : > { %v816_v22 = vpop.f32.mrf.mxu1 }
 0x11e   : > { %v1959_v46 = vadd.f32 %v866_v21, %v816_v22 }
 0x120   : > { %v882_v48 = vsel %vm881_vm3, %v1959_v46, 0.0  ;;  %v910_v49 = vmul.f32 %v1959_v46, %v1959_v46 }
 0x122   : > { %v915_v50 = vsel %vm881_vm3, %v910_v49, 0.0 }
 0x125   : > { %v819_v24 = vpop.f32.mrf.mxu1 }
 0x126   : > { %v1934_v25 = vadd.f32 %v869_v23, %v819_v24 }
 0x128   : > { %v885_v27 = vsel %vm881_vm3, %v1934_v25, 0.0  ;;  %v911_v40 = vmul.f32 %v1934_v25, %v1934_v25 }
 0x129   : > { %886 = vadd.xlane.f32.xlu2 %v885_v27 }
 0x12a   : > { %v918_v44 = vsel %vm881_vm3, %v911_v40, 0.0 }
 0x12d   : > { %v822_v28 = vpop.f32.mrf.mxu1 }
 0x12e   : > { %v1938_v29 = vadd.f32 %v872_v26, %v822_v28 }
 0x130   : > { %v888_v30 = vsel %vm881_vm3, %v1938_v29, 0.0  ;;  %v912_v45 = vmul.f32 %v1938_v29, %v1938_v29 }
 0x131   : > { %889 = vadd.xlane.f32.xlu1 %v888_v30 }
 0x132   : > { %v921_v47 = vsel %vm881_vm3, %v912_v45, 0.0 }
 0x135   : > { %v825_v32 = vpop.f32.mrf.mxu1 }
 0x136   : > { %v1942_v33 = vadd.f32 %v875_v31, %v825_v32 }
 0x138   : > { %v891_v34 = vsel %vm881_vm3, %v1942_v33, 0.0  ;;  %v913_v35 = vmul.f32 %v1942_v33, %v1942_v33 }
 0x139   : > { %892 = vadd.xlane.f32.xlu0 %v891_v34 }
 0x13a   : > { %v924_v36 = vsel %vm881_vm3, %v913_v35, 0.0 }
 0x13b   : > { %925 = vadd.xlane.f32.xlu2 %v924_v36 }
 0x13d   : > { %v828_v38 = vpop.f32.mrf.mxu1 }
 0x13e   : > { %v1949_v39 = vadd.f32 %v878_v37, %v828_v38 }
 0x140   : > { %v895_v41 = vsel %vm894_vm4, %v1949_v39, 0.0  ;;  %v914_v42 = vmul.f32 %v1949_v39, %v1949_v39 }
 0x141   : > { %896 = vadd.xlane.f32.xlu0 %v895_v41 }
 0x142   : > { %v927_v43 = vsel %vm894_vm4, %v914_v42, 0.0 }
 0x143   : > { %928 = vadd.xlane.f32.xlu1 %v927_v43  ;;  %919 = vadd.xlane.f32.xlu2 %v918_v44 }
 0x149   : > { %922 = vadd.xlane.f32.xlu0 %v921_v47 }
 0x14b   : > { %883 = vadd.xlane.f32.xlu1 %v882_v48 }
 0x151   : > { %916 = vadd.xlane.f32.xlu0 %v915_v50 }
 0x19c   : > { %v887_v56 = vpop.xlane.xlu2 %886 }
 0x19d   : > { %v1976_v3 = vmul.f32 %v1967_v58, %v887_v56 }
 0x19f   : > { %v936_v9 = vmul.f32 %v1976_v3, %v1976_v3 }
 0x1a4   : > { %v890_v61 = vpop.xlane.xlu1 %889 }
 0x1a5   : > { %v1990_v13 = vmul.f32 %v1967_v58, %v890_v61 }
 0x1a7   : > { %v937_v19 = vmul.f32 %v1990_v13, %v1990_v13 }
 0x1ac   : > { %v893_v59 = vpop.xlane.xlu0 %892 }
 0x1ad   : > { %v1970_v60 = vmul.f32 %v1967_v58, %v893_v59 }
 0x1ae   : > { %v926_v62 = vpop.xlane.xlu2 %925 }
 0x1af   : > { %v938_v63 = vmul.f32 %v1970_v60, %v1970_v60  ;;  %v933_v0 = vmul.f32 %v926_v62, %v1967_v58 }
 0x1b1   : > { %v943_v1 = vsub.f32 %v933_v0, %v938_v63 }
 0x1b3   : > { %v1978_v5 = vadd.f32 1e-05, %v943_v1  ;;  %v1014_v1 = vld [vmem:[%s2019_s23 + $0x20] sm:$0x3] }
 0x1b4   : > { %v897_v4 = vpop.xlane.xlu0 %896 }
 0x1b5   : > { %v1981_v6 = vmul.f32 %v1967_v58, %v897_v4  ;;  %1669 = vrsqrt.f32 %v1978_v5  ;;  %vm991_vm0 = vweird.f32 %v1978_v5 }
 0x1b6   : > { %v929_v7 = vpop.xlane.xlu1 %928  ;;  %v920_v8 = vpop.xlane.xlu2 %919 }
 0x1b7   : > { %v939_v10 = vmul.f32 %v1981_v6, %v1981_v6  ;;  %v934_v11 = vmul.f32 %v929_v7, %v1967_v58  ;;  %v931_v12 = vmul.f32 %v920_v8, %v1967_v58  ;;  %v947_v8 = vld [vmem:[%s2011_s29 + $0x10] sm:$0xff] }
 0x1b9   : > { %v944_v14 = vsub.f32 %v934_v11, %v939_v10  ;;  %v941_v15 = vsub.f32 %v931_v12, %v936_v9 }
 0x1bb   : > { %v954_v16 = vadd.f32 1e-05, %v944_v14  ;;  %v951_v17 = vadd.f32 1e-05, %v941_v15  ;;  %v1996_v22 = vpop.eup %1669 }
 0x1bc   : > { %v923_v18 = vpop.xlane.xlu0 %922  ;;  %v986_v27 = vmul.f32 %v1996_v22, %v1978_v5  ;;  %vm992_vm13 = vweird.f32 %v1996_v22 }
 0x1bd   : > { %1671 = vrsqrt.f32 %v954_v16  ;;  %v932_v20 = vmul.f32 %v923_v18, %v1967_v58  ;;  %vm1001_vm8 = vweird.f32 %v954_v16  ;;  %vm971_vm10 = vweird.f32 %v951_v17  ;;  %vm993_vm2 = vmor %vm991_vm0, %vm992_vm13 }
 0x1be   : > { %1673 = vrsqrt.f32 %v951_v17  ;;  %v884_v21 = vpop.xlane.xlu1 %883  ;;  %v987_v37 = vmul.f32 %v1996_v22, %v986_v27 }
 0x1bf   : > { %v942_v23 = vsub.f32 %v932_v20, %v937_v19  ;;  %v1999_v26 = vmul.f32 %v1967_v58, %v884_v21 }
 0x1c0   : > { %v988_v47 = vmul.f32 0.5, %v987_v37 }
 0x1c1   : > { %v952_v24 = vadd.f32 1e-05, %v942_v23  ;;  %v935_v35 = vmul.f32 %v1999_v26, %v1999_v26 }
 0x1c2   : > { %v989_v56 = vsub.f32 1.5, %v988_v47 }
 0x1c3   : > { %v1672_v28 = vpop.eup %1671  ;;  %1675 = vrsqrt.f32 %v952_v24  ;;  %vm981_vm14 = vweird.f32 %v952_v24 }
 0x1c4   : > { %v1674_v30 = vpop.eup %1673  ;;  %v996_v31 = vmul.f32 %v1672_v28, %v954_v16  ;;  %v917_v32 = vpop.xlane.xlu0 %916  ;;  %vm1002_vm6 = vweird.f32 %v1672_v28  ;;  %v990_v10 = vmul.f32 %v1996_v22, %v989_v56  ;;  %v1012_v16 = vld [vmem:[%s2019_s23 + $0x10] sm:$0xff] }
 0x1c5   : > { %v966_v34 = vmul.f32 %v1674_v30, %v951_v17  ;;  %v930_v36 = vmul.f32 %v917_v32, %v1967_v58  ;;  %vm972_vm7 = vweird.f32 %v1674_v30  ;;  %vm1003_vm9 = vmor %vm1001_vm8, %vm1002_vm6  ;;  %v948_v17 = vld [vmem:[%s2011_s29 + $0x18] sm:$0xff] }
 0x1c6   : > { %v997_v38 = vmul.f32 %v1672_v28, %v996_v31  ;;  %vm973_vm11 = vmor %vm971_vm10, %vm972_vm7  ;;  %v994_v18 = vsel %vm993_vm2, %v1996_v22, %v990_v10  ;;  %v1013_v31 = vld [vmem:[%s2019_s23 + $0x18] sm:$0xff]  ;;  %v1010_v22 = vld [vmem:[%s2019_s23] sm:$0xff]  ;;  %vm1093_vm7 = vcmask 277504   ;;  %vm1258_vm2 = vcmask 1040384  }
 0x1c7   : > { %v967_v40 = vmul.f32 %v1674_v30, %v966_v34  ;;  %v940_v41 = vsub.f32 %v930_v36, %v935_v35  ;;  %v1008_v23 = vmul.f32 %v994_v18, %v948_v17  ;;  %v1011_v36 = vld [vmem:[%s2019_s23 + $0x8] sm:$0xff] }
 0x1c8   : > { %v998_v42 = vmul.f32 0.5, %v997_v38 }
 0x1c9   : > { %v1676_v43 = vpop.eup %1675  ;;  %v968_v44 = vmul.f32 0.5, %v967_v40  ;;  %v950_v45 = vadd.f32 1e-05, %v940_v41 }
 0x1ca   : > { %v999_v48 = vsub.f32 1.5, %v998_v42  ;;  %v976_v49 = vmul.f32 %v1676_v43, %v952_v24  ;;  %vm982_vm12 = vweird.f32 %v1676_v43  ;;  %v945_v24 = vld [vmem:[%s2011_s29] sm:$0xff]  ;;  %s1591_s29 = sshll.u32 %s1894_s27, 2  ;;  %s653_s27 = sand.u32 1, %s1743_s19  }
 0x1cb   : > { %v969_v50 = vsub.f32 1.5, %v968_v44  ;;  %1677 = vrsqrt.f32 %v950_v45  ;;  %vm983_vm15 = vmor %vm981_vm14, %vm982_vm12  ;;  %vm961_vm5 = vweird.f32 %v950_v45  ;;  %s714_s16 = scalar_lea.vmem %s2164_s14, %s1591_s29  ;;  %s710_s17 = scalar_lea.vmem %s2163_s13, %s1591_s29 }
 0x1cc   : > { %v1000_v51 = vmul.f32 %v1672_v28, %v999_v48  ;;  %v977_v52 = vmul.f32 %v1676_v43, %v976_v49 }
 0x1cd   : > { %v970_v55 = vmul.f32 %v1674_v30, %v969_v50 }
 0x1ce   : > { %v978_v57 = vmul.f32 0.5, %v977_v52  ;;  %v1004_v59 = vsel %vm1003_vm9, %v1672_v28, %v1000_v51  ;;  %v1018_v28 = vmul.f32 %v1008_v23, %v1970_v60 }
 0x1cf   : > { %v974_v61 = vsel %vm973_vm11, %v1674_v30, %v970_v55  ;;  %v1009_v62 = vmul.f32 %v1004_v59, %v949_v53 }
 0x1d0   : > { %v979_v63 = vsub.f32 1.5, %v978_v57  ;;  %v1006_v0 = vmul.f32 %v974_v61, %v946_v54  ;;  %v1090_v61 = vld [vmem:[%s684_s20] sm:$0xff] }
 0x1d1   : > { %v1678_v2 = vpop.eup %1677  ;;  %v1019_v4 = vmul.f32 %v1009_v62, %v1981_v6 }
 0x1d2   : > { %v956_v7 = vmul.f32 %v1678_v2, %v950_v45  ;;  %1032 = vperm.xlu2 %1664, %v1006_v0   ;;  %v980_v9 = vmul.f32 %v1676_v43, %v979_v63  ;;  %vm962_vm4 = vweird.f32 %v1678_v2  ;;  %v1016_v35 = vmul.f32 %v1006_v0, %v1976_v3 }
 0x1d3   : > { %v1024_v11 = vsub.f32 %v1014_v1, %v1019_v4  ;;  %vm963_vm6 = vmor %vm961_vm5, %vm962_vm4  ;;  %vm1254_vm4 = vcmask 138240  }
 0x1d4   : > { %v957_v12 = vmul.f32 %v1678_v2, %v956_v7  ;;  %v984_v14 = vsel %vm983_vm15, %v1676_v43, %v980_v9  ;;  %v1021_v37 = vsub.f32 %v1011_v36, %v1016_v35 }
 0x1d5   : > { %1077 = vperm.xlu0 %1666, %v1024_v11   ;;  %v1007_v6 = vmul.f32 %v984_v14, %v947_v8 }
 0x1d6   : > { %v958_v15 = vmul.f32 0.5, %v957_v12 }
 0x1d7   : > { %v1017_v19 = vmul.f32 %v1007_v6, %v1990_v13  ;;  %v1023_v13 = vsub.f32 %v1013_v31, %v1018_v28 }
 0x1d8   : > { %v959_v20 = vsub.f32 1.5, %v958_v15 }
 0x1d9   : > { %v1022_v21 = vsub.f32 %v1012_v16, %v1017_v19 }
 0x1da   : > { %v960_v5 = vmul.f32 %v1678_v2, %v959_v20  ;;  %1037 = vperm.xlu2 %1664, %v1007_v6  }
 0x1db   : > { %1067 = vperm.xlu1 %1665, %v1022_v21  }
 0x1dc   : > { %v964_v27 = vsel %vm963_vm6, %v1678_v2, %v960_v5 }
 0x1dd   : > { %v1005_v30 = vmul.f32 %v964_v27, %v945_v24 }
 0x1df   : > { %v1015_v32 = vmul.f32 %v1005_v30, %v1999_v26 }
 0x1e1   : > { %v1020_v34 = vsub.f32 %v1010_v22, %v1015_v32 }
 0x1e2   : > { %1042 = vperm.xlu2 %1664, %v1008_v23  }
 0x1e3   : > { %1072 = vperm.xlu1 %1665, %v1023_v13   ;;  %1057 = vperm.xlu0 %1666, %v1020_v34  }
 0x1ea   : > { %1027 = vperm.xlu2 %1664, %v1005_v30  }
 0x1eb   : > { %1047 = vperm.xlu1 %1665, %v1009_v62  }
 0x1f3   : > { %1062 = vperm.xlu1 %1665, %v1021_v37  }
 0x22c   : > { %v1033_v38 = vpop.permute.xlu2 %1032 }
 0x22d   : > { %v1051_v53 = vmul.f32 %v1033_v38, %v1934_v25  ;;  %v1091_v25 = vld [vmem:[%s684_s20 + $0x8] sm:$0xff] }
 0x234   : > { %v1038_v60 = vpop.permute.xlu2 %1037 }
 0x235   : > { %v1052_v47 = vmul.f32 %v1038_v60, %v1938_v29 }
 0x23c   : > { %v1043_v42 = vpop.permute.xlu2 %1042 }
 0x23d   : > { %v1053_v44 = vmul.f32 %v1043_v42, %v1942_v33 }
 0x244   : > { %v1028_v3 = vpop.permute.xlu2 %1027 }
 0x245   : > { %v1050_v54 = vmul.f32 %v1028_v3, %v1959_v46  ;;  %v1092_v46 = vld [vmem:[%s684_s20 + $0x10] sm:$0x1]  ;;  %s1579_s20 = sshll.u32 %s653_s27, 2 }
 0x246   : > { %s655_s23 = scalar_lea.vmem [#allocation2], %s1579_s20 }
 0x247   : > { %v1078_v43 = vpop.permute.xlu0 %1077  ;;  %s1369_s29 = sshll.u32 %s655_s23, 4  ;;  %s1370_s29 = int_to_ptr.vmem [resolvable:$true] %s1369_s29 }
 0x24d   : > { %v1068_v40 = vpop.permute.xlu1 %1067 }
 0x24e   : > { %v1082_v50 = vadd.f32 %v1068_v40, %v1052_v47 }
 0x255   : > { %v1073_v41 = vpop.permute.xlu1 %1072  ;;  %v1058_v52 = vpop.permute.xlu0 %1057 }
 0x256   : > { %v1083_v48 = vadd.f32 %v1073_v41, %v1053_v44  ;;  %v1080_v56 = vadd.f32 %v1058_v52, %v1050_v54 }
 0x258   : > { %v1088_v55 = vmax.f32 %v1083_v48, 0.0  ;;  %v1085_v59 = vmax.f32 %v1080_v56, 0.0  ;;  %v1206_v56 = vld [vmem:[%s694_s30 + $0x8] sm:$0xff] }
 0x25d   : > { %v1048_v26 = vpop.permute.xlu1 %1047 }
 0x25e   : > { %v1054_v45 = vmul.f32 %v1048_v26, %v1949_v39  ;;  %v1087_v39 = vmax.f32 %v1082_v50, 0.0 }
 0x260   : > { %v1084_v49 = vadd.f32 %v1078_v43, %v1054_v45  ;;  %v1167_v45 = vld [vmem:[%s2080_s18 + $0x8] sm:$0xff] }
 0x262   : > { %v1089_v51 = vmax.f32 %v1084_v49, 0.0  ;;  %v1168_v49 = vld [vmem:[%s2080_s18 + $0x10] sm:$0x1] }
 0x264   : > { %1610 = vmatpush.msk.msra.mxu3 %vm795_vm1, %v1089_v51  ;;  %vm1138_vm1 = vcmask 122880  }
 0x265   : > { %v1063_v33 = vpop.permute.xlu1 %1062 }
 0x266   : > { %v1081_v29 = vadd.f32 %v1063_v33, %v1051_v53  ;;  %1118 = vmatpush.msra.mxu3 %v1088_v55  ;;  %v1207_v53 = vld [vmem:[%s694_s30 + $0x10] sm:$0x1] }
 0x268   : > { %v1086_v57 = vmax.f32 %v1081_v29, 0.0  ;;  %1119 = vmatpush.msra.mxu3 %v1087_v39 }
 0x26a   : > { %1120 = vmatpush.msra.mxu3 %v1086_v57 }
 0x26c   : > { %1121 = vmatpush.msra.mxu3 %v1085_v59 }
 0x26d   : > { %1611 = vmatmul.msk.f32.vlgmr.msra.gmra.mxu3 %vm1093_vm7, %v1090_v61 }
 0x275   : > { %1612 = vmatmul.msk.f32.gmra.mxu3 %vm1093_vm7, %v1091_v25 }
 0x27d   : > { %1613 = vmatmul.msk.f32.gmra.mxu3 %vm1093_vm7, %v1092_v46  ;;  %v1166_v46 = vld [vmem:[%s2080_s18] sm:$0xff]  ;;  %vm1329_vm7 = vcmask 64512  }
 0x2f0   : > { %v2051_v62 = vpop.f32.mrf.mxu3 }
 0x2f1   : > { %v1132_v10 = vsel %vm881_vm3, %v2051_v62, 0.0  ;;  %v1145_v11 = vmul.f32 %v2051_v62, %v2051_v62 }
 0x2f3   : > { %v1148_v12 = vsel %vm881_vm3, %v1145_v11, 0.0 }
 0x2f8   : > { %v2053_v63 = vpop.f32.mrf.mxu3 }
 0x2f9   : > { %v1135_v0 = vsel %vm881_vm3, %v2053_v63, 0.0  ;;  %v1146_v1 = vmul.f32 %v2053_v63, %v2053_v63 }
 0x2fa   : > { %1136 = vadd.xlane.f32.xlu1 %v1135_v0 }
 0x2fb   : > { %v1151_v4 = vsel %vm881_vm3, %v1146_v1, 0.0 }
 0x300   : > { %v2059_v2 = vpop.f32.mrf.mxu3 }
 0x301   : > { %v1139_v7 = vsel %vm1138_vm1, %v2059_v2, 0.0  ;;  %v1147_v8 = vmul.f32 %v2059_v2, %v2059_v2 }
 0x302   : > { %1152 = vadd.xlane.f32.xlu1 %v1151_v4  ;;  %1140 = vadd.xlane.f32.xlu2 %v1139_v7 }
 0x303   : > { %v1154_v9 = vsel %vm1138_vm1, %v1147_v8, 0.0  ;;  %v1205_v8 = vld [vmem:[%s694_s30] sm:$0xff]  ;;  %vm1354_vm1 = vcmask 124928  }
 0x304   : > { %1155 = vadd.xlane.f32.xlu0 %v1154_v9 }
 0x30a   : > { %1133 = vadd.xlane.f32.xlu2 %v1132_v10 }
 0x312   : > { %1149 = vadd.xlane.f32.xlu2 %v1148_v12 }
 0x36d   : > { %v1137_v14 = vpop.xlane.xlu1 %1136 }
 0x36e   : > { %v1143_v6 = vmul.f32 %v1137_v14, %v1967_v58 }
 0x370   : > { %v1161_v17 = vmul.f32 %v1143_v6, %v1143_v6 }
 0x375   : > { %v1153_v15 = vpop.xlane.xlu1 %1152  ;;  %v1141_v16 = vpop.xlane.xlu2 %1140 }
 0x376   : > { %v1158_v18 = vmul.f32 %v1153_v15, %v1967_v58  ;;  %v1144_v19 = vmul.f32 %v1141_v16, %v1967_v58 }
 0x377   : > { %v1156_v20 = vpop.xlane.xlu0 %1155 }
 0x378   : > { %v1164_v21 = vsub.f32 %v1158_v18, %v1161_v17  ;;  %v1162_v23 = vmul.f32 %v1144_v19, %v1144_v19  ;;  %v1159_v5 = vmul.f32 %v1156_v20, %v1967_v58 }
 0x37a   : > { %v1170_v24 = vadd.f32 1e-05, %v1164_v21  ;;  %v1165_v27 = vsub.f32 %v1159_v5, %v1162_v23 }
 0x37c   : > { %1679 = vrsqrt.f32 %v1170_v24  ;;  %v1171_v28 = vadd.f32 1e-05, %v1165_v27  ;;  %vm1188_vm9 = vweird.f32 %v1170_v24 }
 0x37d   : > { %v1134_v30 = vpop.xlane.xlu2 %1133 }
 0x37e   : > { %1681 = vrsqrt.f32 %v1171_v28  ;;  %v1142_v22 = vmul.f32 %v1134_v30, %v1967_v58  ;;  %vm1198_vm12 = vweird.f32 %v1171_v28 }
 0x380   : > { %v1160_v37 = vmul.f32 %v1142_v22, %v1142_v22 }
 0x382   : > { %v1680_v31 = vpop.eup %1679 }
 0x383   : > { %v1183_v32 = vmul.f32 %v1680_v31, %v1170_v24  ;;  %vm1189_vm8 = vweird.f32 %v1680_v31 }
 0x384   : > { %v1682_v13 = vpop.eup %1681  ;;  %vm1190_vm11 = vmor %vm1188_vm9, %vm1189_vm8 }
 0x385   : > { %v1184_v34 = vmul.f32 %v1680_v31, %v1183_v32  ;;  %v1193_v35 = vmul.f32 %v1682_v13, %v1171_v28  ;;  %v1150_v36 = vpop.xlane.xlu2 %1149  ;;  %vm1199_vm10 = vweird.f32 %v1682_v13 }
 0x386   : > { %v1157_v38 = vmul.f32 %v1150_v36, %v1967_v58  ;;  %vm1200_vm13 = vmor %vm1198_vm12, %vm1199_vm10 }
 0x387   : > { %v1185_v60 = vmul.f32 0.5, %v1184_v34  ;;  %v1194_v40 = vmul.f32 %v1682_v13, %v1193_v35 }
 0x388   : > { %v1163_v41 = vsub.f32 %v1157_v38, %v1160_v37 }
 0x389   : > { %v1186_v42 = vsub.f32 1.5, %v1185_v60  ;;  %v1195_v43 = vmul.f32 0.5, %v1194_v40 }
 0x38a   : > { %v1169_v26 = vadd.f32 1e-05, %v1163_v41  ;;  %v1293_v41 = vld [vmem:[%s702_s21] sm:$0xff]  ;;  %s1618_s21 = sshll.u32 %s1856_s22, 2 }
 0x38b   : > { %v1196_v44 = vsub.f32 1.5, %v1195_v43  ;;  %v1187_v47 = vmul.f32 %v1680_v31, %v1186_v42  ;;  %s1367_s30 = scalar_lea.hbm %s2165_s15, %s1618_s21  ;;  %s1709_s21 = scalar_lea.hbm %s2165_s15, 20 }
 0x38c   : > { %1683 = vrsqrt.f32 %v1169_v26  ;;  %vm1178_vm15 = vweird.f32 %v1169_v26 }
 0x38d   : > { %v1191_v48 = vsel %vm1190_vm11, %v1680_v31, %v1187_v47  ;;  %v1197_v3 = vmul.f32 %v1682_v13, %v1196_v44  ;;  %v1306_v44 = vld [vmem:[%s706_s28] sm:$0xff] }
 0x38e   : > { %v1203_v50 = vmul.f32 %v1191_v48, %v1167_v45  ;;  %v1323_v47 = vld [vmem:[%s714_s16] sm:$0x7]  ;;  %s1371_s16 = sshll.u32 %s1367_s30, 4  ;;  %s1372_s16 = int_to_ptr.hbm [resolvable:$true] %s1371_s16 }
 0x38f   : > { %v1201_v51 = vsel %vm1200_vm13, %v1682_v13, %v1197_v3  ;;  %s1703_s26 = sshra.s32 %s1372_s16, 4  ;;  %s1704_s26 = int_to_ptr.hbm [resolvable:$true] %s1703_s26 }
 0x390   : > { %1221 = vperm.xlu1 %1665, %v1203_v50   ;;  %v1204_v52 = vmul.f32 %v1201_v51, %v1168_v49  ;;  %v1209_v33 = vmul.f32 %v1203_v50, %v1143_v6  ;;  %s1705_s22 = scalar_lea.hbm %s1704_s26, 4  ;;  %p1710_p0 = scmp.lt.s32.totalorder %s1704_s26, %s2165_s15 }
 0x391   : > { %p1706_p11 = scmp.ne.s32.totalorder %s1704_s26, %s1705_s22  ;;  %p1711_p1 = scmp.lt.s32.totalorder %s1709_s21, %s1705_s22 }
 0x392   : > { %v1684_v54 = vpop.eup %1683  ;;  %1226 = vperm.xlu0 %1666, %v1204_v52   ;;  %v1210_v55 = vmul.f32 %v1204_v52, %v1144_v19  ;;  %v1212_v59 = vsub.f32 %v1206_v56, %v1209_v33  ;;  %v1322_v52 = vld [vmem:[%s710_s17] sm:$0x7] }
 0x393   : > { %v1173_v39 = vmul.f32 %v1684_v54, %v1169_v26  ;;  %vm1179_vm14 = vweird.f32 %v1684_v54  ;;  %p1707_p12 = pnand %p1706_p11, %p1873_p5  ;;  %p1712_p2 = por %p1711_p1, %p1710_p0 }
 0x394   : > { %v1213_v29 = vsub.f32 %v1207_v53, %v1210_v55  ;;  %vm1180_vm0 = vmor %vm1178_vm15, %vm1179_vm14 }
 0x395   : > { %v1174_v57 = vmul.f32 %v1684_v54, %v1173_v39  ;;  %p1708_p13 = pneg %p1707_p12 }
 0x396   : > { %1244 = vperm.xlu2 %1664, %v1213_v29  }
 0x397   : > { %v1175_v61 = vmul.f32 0.5, %v1174_v57  ;;  %p1713_p3 = pnand %p1712_p2, %p1708_p13 }
 0x398   : > { %1239 = vperm.xlu1 %1665, %v1212_v59  }
 0x399   : > { %v1176_v25 = vsub.f32 1.5, %v1175_v61 }
 0x39b   : > { %v1177_v0 = vmul.f32 %v1684_v54, %v1176_v25 }
 0x39d   : > { %v1181_v1 = vsel %vm1180_vm0, %v1684_v54, %v1177_v0 }
 0x39e   : > { %v1202_v4 = vmul.f32 %v1181_v1, %v1166_v46 }
 0x3a0   : > { %1216 = vperm.xlu0 %1666, %v1202_v4   ;;  %v1208_v7 = vmul.f32 %v1202_v4, %v1142_v22 }
 0x3a2   : > { %v1211_v9 = vsub.f32 %v1205_v8, %v1208_v7 }
 0x3a8   : > { %1234 = vperm.xlu0 %1666, %v1211_v9  }
 0x3f0   : > { %v1245_v14 = vpop.permute.xlu2 %1244 }
 0x402   : > { %v1222_v10 = vpop.permute.xlu1 %1221 }
 0x403   : > { %v1230_v15 = vmul.f32 %v1222_v10, %v2053_v63  ;;  %v1253_v63 = vld [vmem:[%s698_s25] sm:$0xff]  ;;  %s1357_s25 = scalar_lea.sflag [#allocation3], %s653_s27 }
 0x404   : > { %v1227_v11 = vpop.permute.xlu0 %1226 }
 0x405   : > { %v1231_v12 = vmul.f32 %v1227_v11, %v2059_v2 }
 0x407   : > { %v1249_v6 = vadd.f32 %v1245_v14, %v1231_v12 }
 0x409   : > { %v1252_v16 = vmax.f32 %v1249_v6, 0.0 }
 0x40a   : > { %v1240_v17 = vpop.permute.xlu1 %1239 }
 0x40b   : > { %v1248_v18 = vadd.f32 %v1240_v17, %v1230_v15  ;;  %1614 = vmatpush.msk.msrb.mxu3 %vm1258_vm2, %v1252_v16 }
 0x40d   : > { %v1251_v19 = vmax.f32 %v1248_v18, 0.0 }
 0x40f   : > { %1276 = vmatpush.msrb.mxu3 %v1251_v19 }
 0x412   : > { %v1217_v20 = vpop.permute.xlu0 %1216 }
 0x413   : > { %v1229_v21 = vmul.f32 %v1217_v20, %v2051_v62 }
 0x41a   : > { %v1235_v23 = vpop.permute.xlu0 %1234 }
 0x41b   : > { %v1247_v2 = vadd.f32 %v1235_v23, %v1229_v21 }
 0x41d   : > { %v1250_v5 = vmax.f32 %v1247_v2, 0.0 }
 0x41f   : > { %1277 = vmatpush.msrb.mxu3 %v1250_v5 }
 0x420   : > { %1615 = vmatmul.msk.f32.vlgmr.msrb.gmra.mxu3 %vm1254_vm4, %v1253_v63 }
 0x4a3   : > { %v1279_v24 = vpop.f32.mrf.mxu3 }
 0x4a4   : > { %v1286_v27 = vmul.f32 %v1279_v24, %v1279_v24  ;;  %v1282_v28 = vsel %vm881_vm3, %v1279_v24, 0.0 }
 0x4a5   : > { %1283 = vadd.xlane.f32.xlu2 %v1282_v28 }
 0x4a6   : > { %v1287_v30 = vsel %vm881_vm3, %v1286_v27, 0.0 }
 0x4a7   : > { %1288 = vadd.xlane.f32.xlu1 %v1287_v30 }
 0x518   : > { %v1284_v62 = vpop.xlane.xlu2 %1283 }
 0x519   : > { %v1285_v31 = vmul.f32 %v1284_v62, %v1967_v58 }
 0x51a   : > { %v1289_v22 = vpop.xlane.xlu1 %1288 }
 0x51b   : > { %v1291_v32 = vmul.f32 %v1285_v31, %v1285_v31  ;;  %v1290_v13 = vmul.f32 %v1289_v22, %v1967_v58 }
 0x51d   : > { %v1292_v34 = vsub.f32 %v1290_v13, %v1291_v32 }
 0x51f   : > { %v1294_v35 = vadd.f32 1e-05, %v1292_v34 }
 0x521   : > { %1685 = vrsqrt.f32 %v1294_v35  ;;  %vm1301_vm5 = vweird.f32 %v1294_v35 }
 0x527   : > { %v1686_v36 = vpop.eup %1685 }
 0x528   : > { %v1296_v37 = vmul.f32 %v1686_v36, %v1294_v35  ;;  %vm1302_vm3 = vweird.f32 %v1686_v36 }
 0x529   : > { %vm1303_vm6 = vmor %vm1301_vm5, %vm1302_vm3 }
 0x52a   : > { %v1297_v38 = vmul.f32 %v1686_v36, %v1296_v37 }
 0x52c   : > { %v1298_v60 = vmul.f32 0.5, %v1297_v38 }
 0x52e   : > { %v1299_v40 = vsub.f32 1.5, %v1298_v60 }
 0x530   : > { %v1300_v42 = vmul.f32 %v1686_v36, %v1299_v40 }
 0x532   : > { %v1304_v58 = vsel %vm1303_vm6, %v1686_v36, %v1300_v42 }
 0x533   : > { %v1305_v43 = vmul.f32 %v1304_v58, %v1293_v41 }
 0x535   : > { %1311 = vperm.xlu0 %1666, %v1305_v43   ;;  %v1307_v26 = vmul.f32 %v1305_v43, %v1285_v31 }
 0x537   : > { %v1308_v45 = vsub.f32 %v1306_v44, %v1307_v26 }
 0x53d   : > { %1317 = vperm.xlu0 %1666, %v1308_v45  }
 0x545   : > { %1326 = vperm.xlu0 %1666, %v1323_v47  }
 0x5a7   : > { %v1312_v48 = vpop.permute.xlu0 %1311 }
 0x5a8   : > { %v1314_v49 = vmul.f32 %v1312_v48, %v1279_v24 }
 0x5af   : > { %v1318_v3 = vpop.permute.xlu0 %1317 }
 0x5b0   : > { %v1320_v50 = vadd.f32 %v1318_v3, %v1314_v49 }
 0x5b2   : > { %v1321_v51 = vmax.f32 %v1320_v50, 0.0 }
 0x5b4   : > { %1348 = vmatpush.msrb.mxu1 %v1321_v51 }
 0x5b5   : > { %1616 = vmatmul.msk.f32.vlgmr.msrb.gmra.mxu1 %vm1329_vm7, %v1322_v52 }
 0x5b7   : > { %v1327_v53 = vpop.permute.xlu0 %1326 }
 0x632   : > { %v1350_v54 = vpop.f32.mrf.mxu1 }
 0x633   : > { %v1351_v55 = vadd.f32 %v1350_v54, %v1327_v53 }
 0x635   : > { %1687 = vtanh.f32 %v1351_v55 }
 0x63b   : > { %v1688_v33 = vpop.eup %1687 }
 0x63c   : > { %1355 = vst.msk [vmem:[%s655_s23] sm:$0x7] %vm1354_vm1, %v1688_v33 }
 0x63d   : > { %1716 = shalt.err (!%p1713_p3)
}
 0x63e   : > { %1623 = dma.vmem_to_hbm [thread:$0]  (%p1873_p5), %s1370_s29, 64, %s1372_s16, %s1357_s25  }
 0x63f PF: > { %s2186_s27 = sld [smem:[#allocation7_spill]] }
 0x640   : > { %s2187_s30 = sld [smem:[#allocation5_spill]] }
 0x645   : > { %p1629_p4 = scmp.ge.s32.totalorder %s2186_s27, 2 }
 0x646   : > { %s1383_s0 = sand.u32 1, %s2187_s30  }
 0x647   : > { %p1626_p7 = pnand %p1629_p4, %p1877_p6  ;;  %s1384_s17 = scalar_lea.sflag [#allocation3], %s1383_s0 }
 0x649   : > { %p1627_p8 = pneg %p1626_p7 }
 0x64b   : > { %1734 = dma.done.wait (%p1627_p8), %s1384_s17, 64  }
 0x64c   : > { %1736 = vsyncadd (%p1627_p8), %s1384_s17, 4294967232  ;;  %s2189_s21 = sld [smem:[#allocation8_spill]]  ;;  %s2192_s18 = smov %s1743_s19 }
 0x64d   : > { %s2190_s26 = sld [smem:[#allocation6_spill]] }
 0x64e   : > { %s2191_s20 = sld [smem:[#allocation9_spill]] }
 0x652   : > { %p25_p9 = scmp.ge.s32.totalorder %s2189_s21, 7  }
 0x653   : > { %s2193_s19 = smov %s2190_s26 }
 0x654   :  { %27 = sbr.rel (!%p25_p9) target bundleno = 5 (0x5), region = 151 }
 0x659   :  { %1390 = vsyncpa [#allocation3], 1 }
 0x65a   :  { %1392 = vsyncpa [#allocation3 + $0x1], 1 }

</bundles_post_ra>
